<compile_context>
chip_gen: v5e
topology: v5e:2x2
jax: 0.10.0
libtpu: 0.0.40
codegen_flags: <defaults>
</compile_context>

<pallas_src>
import numpy as np
import jax
import jax.numpy as jnp
from jax import lax
from jax.experimental import pallas as pl
from jax.experimental.pallas import tpu as pltpu


def round_up(x, m):
    return (x + m - 1) // m * m


# ----------------------------------------------------------------------------
# Pallas kernels
# ----------------------------------------------------------------------------
def matmul_bias_kernel(x_ref, w_ref, b_ref, o_ref):
    """One row-tile of  X @ W + b  (bf16 operands, f32 accumulate, bf16 store)."""
    o_ref[...] = (jnp.dot(x_ref[...], w_ref[...], preferred_element_type=jnp.float32)
                  + b_ref[...]).astype(o_ref.dtype)


def bilstm_kernel(lens_ref, xproj_ref, whhf_ref, whhb_ref, outf_ref, outb_ref,
                  hf_scr, cf_scr, hb_scr, cb_scr):
    """Both LSTM directions, interleaved per time step, full sequence in one invocation.

    The input projection (x @ W_ih + b) is precomputed, so each step only does
    gates = x_proj[s] + h @ W_hh per direction.  Forward uses time t, backward uses T-1-t,
    each masked by its own sequence length (pack_padded_sequence semantics).
    """
    T = xproj_ref.shape[0]
    Hp = outf_ref.shape[-1]
    G4 = 4 * Hp

    hf_scr[...] = jnp.zeros_like(hf_scr)
    cf_scr[...] = jnp.zeros_like(cf_scr)
    hb_scr[...] = jnp.zeros_like(hb_scr)
    cb_scr[...] = jnp.zeros_like(cb_scr)
    lens = lens_ref[...]                          # (Bp, 1) int32, loaded once (hoisted)

    def cell(x_g, h, c, whh_ref):
        # bf16 x_g promotes to f32 when added to the f32 matmul result
        gates = jnp.dot(h.astype(jnp.bfloat16), whh_ref[...],
                        preferred_element_type=jnp.float32) + x_g
        i_g = jax.nn.sigmoid(gates[:, 0 * Hp:1 * Hp])
        f_g = jax.nn.sigmoid(gates[:, 1 * Hp:2 * Hp])
        g_g = jnp.tanh(gates[:, 2 * Hp:3 * Hp])
        o_g = jax.nn.sigmoid(gates[:, 3 * Hp:4 * Hp])
        c_new = f_g * c + i_g * g_g
        h_new = o_g * jnp.tanh(c_new)
        return h_new, c_new

    def step(t, carry):
        rt = T - 1 - t
        x_f = xproj_ref[t]                        # (Bp, 8*Hp) bf16   fwd half = [:, :4Hp]
        x_b = xproj_ref[rt]                       #                   bwd half = [:, 4Hp:]
        h_f = hf_scr[...]
        c_f = cf_scr[...]
        h_b = hb_scr[...]
        c_b = cb_scr[...]
        # Both directions issued in the same step body -> the LLO scheduler can overlap one
        # direction's MXU push with the other's EUP/VPU gate math (latency-bound recurrence).
        hf_new, cf_new = cell(x_f[:, :G4], h_f, c_f, whhf_ref)
        hb_new, cb_new = cell(x_b[:, G4:], h_b, c_b, whhb_ref)

        vf = t < lens                             # (Bp, 1) bool
        vb = rt < lens
        hf_scr[...] = jnp.where(vf, hf_new, h_f)
        cf_scr[...] = jnp.where(vf, cf_new, c_f)
        hb_scr[...] = jnp.where(vb, hb_new, h_b)
        cb_scr[...] = jnp.where(vb, cb_new, c_b)
        outf_ref[t] = jnp.where(vf, hf_new, 0.0).astype(outf_ref.dtype)
        outb_ref[rt] = jnp.where(vb, hb_new, 0.0).astype(outb_ref.dtype)
        return carry

    # Steps are serially dependent: a small bounded unroll keeps LLO scheduling visibility
    # without blowing up instruction memory / compile time for long sequences.
    lax.fori_loop(0, T, step, 0, unroll=4)


def head_kernel(xf_ref, xb_ref, fwf_ref, fwb_ref, fb_ref, cw_ref, cb_ref, o_ref):
    """fc -> ELU(alpha=0.01, as in the module) -> classifier.  Dropout is identity at inference.

    The fc K-dim is split into the forward / backward hidden halves so the LSTM kernel's two
    bf16 outputs are consumed directly (no lane-concat pass over the activations).
    """
    h = (jnp.dot(xf_ref[...], fwf_ref[...], preferred_element_type=jnp.float32)
         + jnp.dot(xb_ref[...], fwb_ref[...], preferred_element_type=jnp.float32)
         + fb_ref[...])
    h = jnp.where(h > 0, h, 0.01 * (jnp.exp(h) - 1.0))     # ELU, alpha=0.01 (per the module)
    o_ref[...] = (jnp.dot(h.astype(jnp.bfloat16), cw_ref[...],
                          preferred_element_type=jnp.float32) + cb_ref[...])


# ----------------------------------------------------------------------------
# pallas_call wrappers
# ----------------------------------------------------------------------------
def _row_tile(M, tile_m):
    """Pick (padded rows, row tile).  Single full-dim block when it fits under tile_m."""
    Mp8 = round_up(M, 8)
    if Mp8 <= tile_m:
        return Mp8, Mp8
    return round_up(M, tile_m), tile_m


def matmul_bias(x, w, b, tile_m=512):
    """x:(M,K) bf16, w:(K,N) bf16, b:(1,N) f32 -> (M,N) bf16, row-tiled."""
    M, K = x.shape
    N = w.shape[1]
    Mp, tm = _row_tile(M, tile_m)
    if Mp != M:
        x = jnp.pad(x, ((0, Mp - M), (0, 0)))
    out = pl.pallas_call(
        matmul_bias_kernel,
        out_shape=jax.ShapeDtypeStruct((Mp, N), jnp.bfloat16),
        grid_spec=pltpu.PrefetchScalarGridSpec(
            num_scalar_prefetch=0,
            grid=(Mp // tm,),
            in_specs=[pl.BlockSpec((tm, K), lambda i: (i, 0)),
                      pl.BlockSpec((K, N), lambda i: (0, 0)),
                      pl.BlockSpec((1, N), lambda i: (0, 0))],
            out_specs=pl.BlockSpec((tm, N), lambda i: (i, 0))),
        compiler_params=pltpu.CompilerParams(dimension_semantics=("parallel",)),
    )(x, w, b)
    return out[:M]


def bilstm_layer(xproj_tm, lens_p, whh_f, whh_b):
    """xproj_tm:(T,Bp,8*Hp) bf16, lens_p:(Bp,1) i32, whh_*:(Hp,4*Hp) bf16
    -> (out_f, out_b), each (T,Bp,Hp) bf16."""
    T, Bp, eight_hp = xproj_tm.shape
    Hp = eight_hp // 8

    # Resident-VMEM estimate for the whole-T blocks (no inner pipelining at grid=(1,)),
    # doubled for buffering headroom.  TODO(synk): T-chunk streaming for very long T on v7x.
    vmem_bytes = (T * Bp * eight_hp * 2          # xproj (bf16)
                  + 2 * T * Bp * Hp * 2          # two bf16 outputs
                  + 2 * Hp * 4 * Hp * 2          # W_hh fwd/bwd (bf16)
                  + Bp * 4                       # lens
                  + 4 * Bp * Hp * 4)             # h/c scratch (f32)
    vmem_limit = int(max(32 * 1024 * 1024, 2 * vmem_bytes + (2 << 20)))

    return pl.pallas_call(
        bilstm_kernel,
        out_shape=(jax.ShapeDtypeStruct((T, Bp, Hp), jnp.bfloat16),
                   jax.ShapeDtypeStruct((T, Bp, Hp), jnp.bfloat16)),
        grid_spec=pltpu.PrefetchScalarGridSpec(
            num_scalar_prefetch=0,
            grid=(1,),                                              # single invocation
            in_specs=[
                pl.BlockSpec((Bp, 1), lambda i: (0, 0)),            # lengths
                pl.BlockSpec((T, Bp, eight_hp), lambda i: (0, 0, 0)),  # bf16 x-projection
                pl.BlockSpec((Hp, 4 * Hp), lambda i: (0, 0)),       # W_hh forward
                pl.BlockSpec((Hp, 4 * Hp), lambda i: (0, 0)),       # W_hh backward
            ],
            out_specs=(pl.BlockSpec((T, Bp, Hp), lambda i: (0, 0, 0)),
                       pl.BlockSpec((T, Bp, Hp), lambda i: (0, 0, 0))),
            scratch_shapes=[pltpu.VMEM((Bp, Hp), jnp.float32) for _ in range(4)],
        ),
        compiler_params=pltpu.CompilerParams(
            dimension_semantics=("arbitrary",),
            vmem_limit_bytes=vmem_limit),
    )(lens_p, xproj_tm, whh_f, whh_b)


def head_call(xf, xb, fwf, fwb, fb, cw, cb, tile_m=512):
    """xf/xb:(M,Hp) bf16 -> logits (M, Cp) f32, row-tiled."""
    M, Hp = xf.shape
    Lp = fwf.shape[1]
    Cp = cw.shape[1]
    Mp, tm = _row_tile(M, tile_m)
    if Mp != M:
        xf = jnp.pad(xf, ((0, Mp - M), (0, 0)))
        xb = jnp.pad(xb, ((0, Mp - M), (0, 0)))
    out = pl.pallas_call(
        head_kernel,
        out_shape=jax.ShapeDtypeStruct((Mp, Cp), jnp.float32),
        grid_spec=pltpu.PrefetchScalarGridSpec(
            num_scalar_prefetch=0,
            grid=(Mp // tm,),
            in_specs=[pl.BlockSpec((tm, Hp), lambda i: (i, 0)),
                      pl.BlockSpec((tm, Hp), lambda i: (i, 0)),
                      pl.BlockSpec((Hp, Lp), lambda i: (0, 0)),
                      pl.BlockSpec((Hp, Lp), lambda i: (0, 0)),
                      pl.BlockSpec((1, Lp), lambda i: (0, 0)),
                      pl.BlockSpec((Lp, Cp), lambda i: (0, 0)),
                      pl.BlockSpec((1, Cp), lambda i: (0, 0))],
            out_specs=pl.BlockSpec((tm, Cp), lambda i: (i, 0))),
        compiler_params=pltpu.CompilerParams(dimension_semantics=("parallel",)),
    )(xf, xb, fwf, fwb, fb, cw, cb)
    return out[:M]


# ----------------------------------------------------------------------------
# Weight padding helpers (zero padding is exact: padded hidden channels stay 0)
# ----------------------------------------------------------------------------
def pad_gate_cols(w, H, Hp):
    """(R, 4H) -> (R, 4Hp): each gate's H columns placed at the start of its Hp slot."""
    R = w.shape[0]
    out = jnp.zeros((R, 4 * Hp), w.dtype)
    for k in range(4):
        out = out.at[:, k * Hp:k * Hp + H].set(w[:, k * H:(k + 1) * H])
    return out


def place_rows_bidir(w, H, Hp):
    """(2H, N) -> (2Hp, N): forward-h rows at [0:H], backward-h rows at [Hp:Hp+H]."""
    N = w.shape[1]
    out = jnp.zeros((2 * Hp, N), w.dtype)
    out = out.at[:H, :].set(w[:H, :])
    out = out.at[Hp:Hp + H, :].set(w[H:2 * H, :])
    return out


def pad_cols(w, Np):
    return jnp.zeros(w.shape[:-1] + (Np,), w.dtype).at[..., :w.shape[-1]].set(w)


def pad_rows(w, Rp):
    return jnp.zeros((Rp,) + w.shape[1:], w.dtype).at[:w.shape[0]].set(w)


# ----------------------------------------------------------------------------
# Forward pass (embedding gather + layout glue in JAX, hot path in Pallas)
# ----------------------------------------------------------------------------
def bilstm_glove_forward(sen, sen_len, params):
    B, T = sen.shape
    Bp, Hp = params["Bp"], params["Hp"]

    # time-major embedding gather (glue): avoids a (B,T,E)->(T,B,E) activation transpose
    emb_tm = jnp.take(params["emb"], sen.T, axis=0)                   # (T, B, E) f32
    E = emb_tm.shape[-1]

    lens = jnp.asarray(sen_len, jnp.int32)
    lens_p = jnp.zeros((Bp, 1), jnp.int32).at[:B, 0].set(lens)        # padded rows -> len 0

    x = jnp.zeros((T, Bp, E), jnp.bfloat16).at[:, :B, :].set(emb_tm.astype(jnp.bfloat16))

    # layer 0: hoisted input projection, both directions & all timesteps, one MXU GEMM (bf16 out)
    xproj = matmul_bias(x.reshape(T * Bp, E), params["wih_cat"][0], params["b_cat"][0])
    out_f, out_b = bilstm_layer(xproj.reshape(T, Bp, 8 * Hp), lens_p,
                                params["whh_f"][0], params["whh_b"][0])

    for layer in range(1, params["lstm_layers"]):
        # inter-layer activations stay bf16; the concat is XLA glue (not hit in the 1-layer demo)
        flat = jnp.concatenate([out_f, out_b], axis=-1).reshape(T * Bp, 2 * Hp)
        xproj = matmul_bias(flat, params["wih_cat"][layer], params["b_cat"][layer])
        out_f, out_b = bilstm_layer(xproj.reshape(T, Bp, 8 * Hp), lens_p,
                                    params["whh_f"][layer], params["whh_b"][layer])

    # dropout -> identity (inference); fc -> ELU -> classifier consumes the two bf16 halves
    logits = head_call(out_f.reshape(T * Bp, Hp), out_b.reshape(T * Bp, Hp),
                       params["fcw_f"], params["fcw_b"], params["fc_b_p"],
                       params["cls_w_p"], params["cls_b_p"])          # (T*Bp, Cp) f32

    # slice to (B, tag_size) BEFORE transposing -> far fewer glue bytes moved
    logits = logits.reshape(T, Bp, -1)[:, :B, :params["tag_size"]]
    logits = jnp.transpose(logits, (1, 0, 2))                         # (B, T, tag)

    # pad_packed_sequence trims to max(sen_len); host-side slice keeps kernel shapes static
    max_len = int(np.max(np.asarray(sen_len)))
    return logits[:, :max_len, :]


# ----------------------------------------------------------------------------
# Pure-JAX reference (same math, unpadded shapes) for the correctness check
# ----------------------------------------------------------------------------
def reverse_by_length(x, lens, T):
    ar = jnp.arange(T)[None, :]
    idx = jnp.clip(lens[:, None] - 1 - ar, 0, T - 1)
    g = jnp.take_along_axis(x, idx[:, :, None], axis=1)
    mask = (ar < lens[:, None])[:, :, None]
    return jnp.where(mask, g, 0.0)


def _ref_lstm_dir(x_bt, lens, wih, whh, b):
    B, T, Fin = x_bt.shape
    H = whh.shape[0]
    # hoisted x-projection, rounded to bf16 to mirror the kernel's bf16 xproj storage
    xproj = (jnp.dot(x_bt.reshape(B * T, Fin).astype(jnp.bfloat16), wih,
                     preferred_element_type=jnp.float32) + b).astype(jnp.bfloat16)
    xproj = xproj.reshape(B, T, 4 * H)

    def step(carry, inp):
        h, c = carry
        xp_t, t = inp
        gates = (jnp.dot(h.astype(jnp.bfloat16), whh, preferred_element_type=jnp.float32)
                 + xp_t.astype(jnp.float32))
        i_g = jax.nn.sigmoid(gates[:, :H]); f_g = jax.nn.sigmoid(gates[:, H:2 * H])
        g_g = jnp.tanh(gates[:, 2 * H:3 * H]); o_g = jax.nn.sigmoid(gates[:, 3 * H:])
        c_new = f_g * c + i_g * g_g
        h_new = o_g * jnp.tanh(c_new)
        m = (t < lens)[:, None]
        c = jnp.where(m, c_new, c); h = jnp.where(m, h_new, h)
        return (h, c), jnp.where(m, h_new, 0.0)

    xp_tm = jnp.transpose(xproj, (1, 0, 2))
    (_, _), outs = lax.scan(step,
                            (jnp.zeros((B, H), jnp.float32), jnp.zeros((B, H), jnp.float32)),
                            (xp_tm, jnp.arange(T)))
    return jnp.transpose(outs, (1, 0, 2))


def _ref_forward(sen, sen_len, rp):
    emb = jnp.take(rp["emb"], sen, axis=0).astype(jnp.float32)
    B, T, _ = emb.shape
    lens = jnp.asarray(sen_len, jnp.int32)
    layer_in = emb
    for layer in range(rp["lstm_layers"]):
        outs = []
        for d in range(2):
            x_in = layer_in if d == 0 else reverse_by_length(layer_in, lens, T)
            o = _ref_lstm_dir(x_in, lens, rp["wih"][layer][d],
                              rp["whh"][layer][d], rp["b"][layer][d])
            if d == 1:
                o = reverse_by_length(o, lens, T)
            outs.append(o)
        layer_in = jnp.concatenate(outs, axis=-1)
    max_len = int(np.max(np.asarray(sen_len)))
    lstm_out = layer_in[:, :max_len, :]
    flat = lstm_out.reshape(B * max_len, -1)
    h = jnp.dot(flat.astype(jnp.bfloat16), rp["fc_w"],
                preferred_element_type=jnp.float32) + rp["fc_b"]
    h = jnp.where(h > 0, h, 0.01 * (jnp.exp(h) - 1.0))
    logits = jnp.dot(h.astype(jnp.bfloat16), rp["cls_w"],
                     preferred_element_type=jnp.float32) + rp["cls_b"]
    return logits.reshape(B, max_len, rp["tag_size"])


# ----------------------------------------------------------------------------
# Main
# ----------------------------------------------------------------------------
if __name__ == "__main__":
    # Small, deterministic configuration consistent with the module's __init__.
    B, T = 2, 8
    vocab_size = 50
    embedding_dim = 32
    hidden_dim = 32
    linear_out_dim = 32
    tag_size = 8
    lstm_layers = 1

    H = hidden_dim
    Hp = round_up(H, 128)               # lane-aligned hidden
    Bp = round_up(B, 16)                # 16-row sublane multiple for bf16 activations
    Lp = round_up(linear_out_dim, 128)
    Cp = round_up(tag_size, 128)

    key = jax.random.PRNGKey(0)
    ks = jax.random.split(key, 64)
    ki = 0

    def init(k, shape, scale=0.1):
        return scale * jax.random.normal(k, shape, jnp.float32)

    # LSTM weights per layer / direction: unpadded bf16 for the reference, padded for the kernels.
    wih_raw, whh_raw, b_raw = [], [], []
    wih_cat, b_cat, whh_f_p, whh_b_p = [], [], [], []
    for layer in range(lstm_layers):
        in_dim = embedding_dim if layer == 0 else 2 * hidden_dim
        wd, hd, bd = [], [], []
        wih_pads, b_pads, whh_pads = [], [], []
        for d in range(2):
            wih_f32 = init(ks[ki], (in_dim, 4 * H)); ki += 1   # stored transposed for x @ W
            whh_f32 = init(ks[ki], (H, 4 * H)); ki += 1
            b_f32 = init(ks[ki], (1, 4 * H)); ki += 1          # b_ih + b_hh combined
            wih_bf = wih_f32.astype(jnp.bfloat16)
            whh_bf = whh_f32.astype(jnp.bfloat16)
            wd.append(wih_bf); hd.append(whh_bf); bd.append(b_f32)

            rows = wih_bf if layer == 0 else place_rows_bidir(wih_bf, H, Hp)
            wih_pads.append(pad_gate_cols(rows, H, Hp))                     # (in_rows, 4*Hp)
            b_pads.append(pad_gate_cols(b_f32, H, Hp))                      # (1, 4*Hp)
            whh_pads.append(pad_gate_cols(pad_rows(whh_bf, Hp), H, Hp))     # (Hp, 4*Hp)
        wih_raw.append(wd); whh_raw.append(hd); b_raw.append(bd)
        wih_cat.append(jnp.concatenate(wih_pads, axis=1))    # (in_rows, 8*Hp) bf16, fwd|bwd
        b_cat.append(jnp.concatenate(b_pads, axis=1))        # (1, 8*Hp) f32
        whh_f_p.append(whh_pads[0])                          # (Hp, 4*Hp) bf16
        whh_b_p.append(whh_pads[1])

    fc_w = init(ks[ki], (2 * H, linear_out_dim)); ki += 1
    fc_b = init(ks[ki], (1, linear_out_dim)); ki += 1
    cls_w = init(ks[ki], (linear_out_dim, tag_size)); ki += 1
    cls_b = init(ks[ki], (1, tag_size)); ki += 1
    emb = init(ks[ki], (vocab_size, embedding_dim), 1.0); ki += 1   # stands in for emb_matrix.npy

    fc_w_bf = fc_w.astype(jnp.bfloat16)
    cls_w_bf = cls_w.astype(jnp.bfloat16)

    params = {
        "emb": emb,
        "wih_cat": wih_cat, "b_cat": b_cat,
        "whh_f": whh_f_p, "whh_b": whh_b_p,
        "fcw_f": pad_cols(pad_rows(fc_w_bf[:H], Hp), Lp),    # (Hp, Lp) bf16 (fwd-hidden rows)
        "fcw_b": pad_cols(pad_rows(fc_w_bf[H:], Hp), Lp),    # (Hp, Lp) bf16 (bwd-hidden rows)
        "fc_b_p": pad_cols(fc_b, Lp),                        # (1, Lp) f32
        "cls_w_p": pad_cols(pad_rows(cls_w_bf, Lp), Cp),     # (Lp, Cp) bf16
        "cls_b_p": pad_cols(cls_b, Cp),                      # (1, Cp) f32
        "lstm_layers": lstm_layers, "tag_size": tag_size,
        "Bp": Bp, "Hp": Hp,
    }

    ref_params = {
        "emb": emb,
        "wih": wih_raw, "whh": whh_raw, "b": b_raw,
        "fc_w": fc_w_bf, "fc_b": fc_b,
        "cls_w": cls_w_bf, "cls_b": cls_b,
        "lstm_layers": lstm_layers, "tag_size": tag_size,
    }

    sen = jax.random.randint(ks[ki], (B, T), 0, vocab_size, dtype=jnp.int32); ki += 1
    sen_len = np.array([8, 5], dtype=np.int32)   # variable lengths (padded batch)

    out = jax.block_until_ready(bilstm_glove_forward(sen, sen_len, params))
    ref = jax.block_until_ready(_ref_forward(sen, sen_len, ref_params))

    assert out.shape == (B, int(sen_len.max()), tag_size)
    np.testing.assert_allclose(np.asarray(out), np.asarray(ref), rtol=2e-3, atol=2e-3)

    print("KERNEL_OK")
</pallas_src>

<mosaic_0001>
module attributes {stable_mosaic.version = 11 : i64} {
  func.func @matmul_bias_kernel(%arg0: i32, %arg1: memref<128x32xbf16, #tpu.memory_space<vmem>>, %arg2: memref<32x1024xbf16, #tpu.memory_space<vmem>>, %arg3: memref<1x1024xf32, #tpu.memory_space<vmem>>, %arg4: memref<128x1024xbf16, #tpu.memory_space<vmem>>) attributes {dimension_semantics = [#tpu.dimension_semantics<parallel>], iteration_bounds = array<i64: 1>, scalar_prefetch = 0 : i64, scratch_operands = 0 : i64, tpu.core_type = #tpu.core_type<tc>, window_params = [{transform_indices = @transform_0, window_bounds = array<i64: 128, 32>}, {pipeline_mode = #tpu.pipeline_mode<synchronous>, transform_indices = @transform_1, window_bounds = array<i64: 32, 1024>}, {pipeline_mode = #tpu.pipeline_mode<synchronous>, transform_indices = @transform_2, window_bounds = array<i64: 1, 1024>}, {transform_indices = @transform_3, window_bounds = array<i64: 128, 1024>}]} {
    %c0 = arith.constant 0 : index
    %c0_0 = arith.constant 0 : index
    %0 = vector.load %arg1[%c0, %c0_0] : memref<128x32xbf16, #tpu.memory_space<vmem>>, vector<128x32xbf16>
    %c0_1 = arith.constant 0 : index
    %c0_2 = arith.constant 0 : index
    %1 = vector.load %arg2[%c0_1, %c0_2] : memref<32x1024xbf16, #tpu.memory_space<vmem>>, vector<32x1024xbf16>
    %cst = arith.constant dense<0.000000e+00> : vector<128x1024xf32>
    %2 = tpu.matmul %0, %1, %cst {dimension_numbers = #tpu.dot_dimension_numbers<[1], [0], [0], [1], [0, 0, 1, 1], [], []>} : vector<128x32xbf16>, vector<32x1024xbf16>, vector<128x1024xf32> -> vector<128x1024xf32>
    %c0_3 = arith.constant 0 : index
    %c0_4 = arith.constant 0 : index
    %3 = vector.load %arg3[%c0_3, %c0_4] : memref<1x1024xf32, #tpu.memory_space<vmem>>, vector<1x1024xf32>
    %4 = vector.broadcast %3 : vector<1x1024xf32> to vector<128x1024xf32>
    %5 = arith.addf %2, %4 : vector<128x1024xf32>
    %6 = arith.truncf %5 : vector<128x1024xf32> to vector<128x1024xbf16>
    %c0_5 = arith.constant 0 : index
    %c0_6 = arith.constant 0 : index
    %7 = vector.load %arg4[%c0_5, %c0_6] : memref<128x1024xbf16, #tpu.memory_space<vmem>>, vector<128x1024xbf16>
    tpu.vector_store %arg4[%c0_5, %c0_6], %6 {strides = array<i32>} : memref<128x1024xbf16, #tpu.memory_space<vmem>>, vector<128x1024xbf16>,
    return
  }
  func.func @transform_0(%arg0: i32) -> (i32, i32) {
    %c0_i32 = arith.constant 0 : i32
    %c0_i32_0 = arith.constant 0 : i32
    return %arg0, %c0_i32 : i32, i32
  }
  func.func @transform_1(%arg0: i32) -> (i32, i32) {
    %c0_i32 = arith.constant 0 : i32
    %c0_i32_0 = arith.constant 0 : i32
    %c0_i32_1 = arith.constant 0 : i32
    return %c0_i32, %c0_i32_0 : i32, i32
  }
  func.func @transform_2(%arg0: i32) -> (i32, i32) {
    %c0_i32 = arith.constant 0 : i32
    %c0_i32_0 = arith.constant 0 : i32
    %c0_i32_1 = arith.constant 0 : i32
    return %c0_i32, %c0_i32_0 : i32, i32
  }
  func.func @transform_3(%arg0: i32) -> (i32, i32) {
    %c0_i32 = arith.constant 0 : i32
    %c0_i32_0 = arith.constant 0 : i32
    return %arg0, %c0_i32 : i32, i32
  }
}

</mosaic_0001>

<bundles_post_ra>
// kernel: tpu_custom_call.1
= control target key start
LH: loop header
LB: loop body
LE: loop exit
PB: predicated region body
PF: predicated region fallthrough
CT: control target
= control target key end

     0   :  { %8 = vsyncpa [#allocation3], 0  ;;  %s1367_s0 = inlined_call_operand.vmem [shape: bf16[128,32], index: 0, kind: input, shape index: {}]   ;;  %s1368_s1 = inlined_call_operand.hbm [shape: bf16[32,1024], index: 1, kind: input, shape index: {}]   ;;  %s1369_s2 = inlined_call_operand.vmem [shape: f32[1,1024], index: 2, kind: input, shape index: {}]   ;;  %s1370_s3 = inlined_call_operand.hbm [shape: bf16[128,1024], index: 3, kind: output, shape index: {}]  }
   0x1   :  { %9 = vsyncpa [#allocation4], 0  ;;  %s16_s14 = sshll.u32 %s1368_s1, 4  ;;  %s1006_s15 = smov [#allocation2]   ;;  %s17_s14 = int_to_ptr.hbm [resolvable:$true] %s16_s14 }
   0x2   :  { %s18_s16 = sshll.u32 %s1006_s15, 4  ;;  %s1007_s17 = smov 512   ;;  %s19_s16 = int_to_ptr.vmem [resolvable:$true] %s18_s16 }
   0x3   :  { %s1008_s18 = smov 32  }
   0x4   :  { %24 = dma.hbm_to_vmem [thread:$0]  %s17_s14, 2048, %s19_s16, [#allocation3], %s1007_s17, %s1007_s17, %s1008_s18  }
   0x5   :  { %1002 = dma.done.wait [#allocation3], 2048  }
   0x6   :  { %1003 = vsyncadd [#allocation3], 4294965248  ;;  %v832_v0 = vld [vmem:[#allocation2 + $0x40] sm:$0xf]  ;;  %v942_v2 = vld [vmem:[#allocation2 + $0x44] sm:$0xf] }
   0x7   :  { %v946_v1 = vld [vmem:[#allocation2 + $0x5c] sm:$0xf0]  ;;  %v834_v4 = vld [vmem:[#allocation2 + $0x60] sm:$0xf0]  ;;  %v840_v5 = vld [vmem:[#allocation2 + $0x48] sm:$0xf] }
   0x8   :  { %v833_v3 = vor.u32 %v946_v1, %v832_v0  ;;  %v947_v6 = vld [vmem:[#allocation2 + $0x64] sm:$0xf0]  ;;  %v837_v7 = vor.u32 %v942_v2, %v834_v4  ;;  %v943_v9 = vld [vmem:[#allocation2 + $0x4c] sm:$0xf]  ;;  %v800_v11 = vld [vmem:[#allocation2] sm:$0xf] }
   0x9   :  { %v841_v8 = vor.u32 %v947_v6, %v840_v5  ;;  %v842_v10 = vld [vmem:[#allocation2 + $0x68] sm:$0xf0]  ;;  %v938_v13 = vld [vmem:[#allocation2 + $0x1c] sm:$0xf0]  ;;  %v934_v14 = vld [vmem:[#allocation2 + $0x4] sm:$0xf] }
   0xa   :  { %233 = vmatpush.bf16.msra.mxu0 %v833_v3  ;;  %v845_v12 = vor.u32 %v943_v9, %v842_v10  ;;  %v802_v15 = vld [vmem:[#allocation2 + $0x20] sm:$0xf0]  ;;  %282 = vmatpush.bf16.msra.mxu1 %v837_v7  ;;  %v801_v16 = vor.u32 %v938_v13, %v800_v11  ;;  %v808_v18 = vld [vmem:[#allocation2 + $0x8] sm:$0xf]  ;;  %v935_v20 = vld [vmem:[#allocation2 + $0xc] sm:$0xf] }
   0xb   :  { %331 = vmatpush.bf16.msra.mxu2 %v841_v8  ;;  %v805_v17 = vor.u32 %v934_v14, %v802_v15  ;;  %v939_v19 = vld [vmem:[#allocation2 + $0x24] sm:$0xf0]  ;;  %v810_v22 = vld [vmem:[#allocation2 + $0x28] sm:$0xf0]  ;;  %v1039_v23 = vld [vmem:[%s1367_s0] sm:$0xff]  ;;  %vm202_vm0 = vcmask 261120  }
   0xc   :  { %380 = vmatpush.bf16.msra.mxu3 %v845_v12  ;;  %v809_v21 = vor.u32 %v939_v19, %v808_v18  ;;  %v856_v24 = vld [vmem:[#allocation2 + $0x58] sm:$0xf]  ;;  %v813_v25 = vor.u32 %v935_v20, %v810_v22  ;;  %v945_v27 = vld [vmem:[#allocation2 + $0x5c] sm:$0xf]  ;;  %v848_v31 = vld [vmem:[#allocation2 + $0x50] sm:$0xf] }
   0xd   :  { %v949_v26 = vld [vmem:[#allocation2 + $0x74] sm:$0xf0]  ;;  %v858_v28 = vld [vmem:[#allocation2 + $0x78] sm:$0xf0]  ;;  %v948_v32 = vld [vmem:[#allocation2 + $0x6c] sm:$0xf0] }
   0xe   :  { %234 = vmatpush.bf16.msra.mxu0 %v801_v16  ;;  %v857_v29 = vor.u32 %v949_v26, %v856_v24  ;;  %v861_v30 = vor.u32 %v945_v27, %v858_v28  ;;  %v944_v33 = vld [vmem:[#allocation2 + $0x54] sm:$0xf]  ;;  %283 = vmatpush.bf16.msra.mxu1 %v805_v17  ;;  %v849_v34 = vor.u32 %v948_v32, %v848_v31  ;;  %v1052_v37 = vld [vmem:[%s1367_s0 + $0x8] sm:$0xff]  ;;  %v824_v39 = vld [vmem:[#allocation2 + $0x18] sm:$0xf]  ;;  %s753_s11 = sshll.u32 %s1370_s3, 4  ;;  %s754_s11 = int_to_ptr.hbm [resolvable:$true] %s753_s11 }
   0xf   :  { %332 = vmatpush.bf16.msra.mxu2 %v809_v21  ;;  %v850_v35 = vld [vmem:[#allocation2 + $0x70] sm:$0xf0]  ;;  %v941_v40 = vld [vmem:[#allocation2 + $0x34] sm:$0xf0]  ;;  %v937_v41 = vld [vmem:[#allocation2 + $0x1c] sm:$0xf] }
  0x10   :  { %381 = vmatpush.bf16.msra.mxu3 %v813_v25  ;;  %v853_v36 = vor.u32 %v944_v33, %v850_v35  ;;  %v1065_v38 = vld [vmem:[%s1367_s0 + $0x10] sm:$0xff]  ;;  %v825_v42 = vor.u32 %v941_v40, %v824_v39  ;;  %v826_v43 = vld [vmem:[#allocation2 + $0x38] sm:$0xf0]  ;;  %v1091_v52 = vld [vmem:[%s1367_s0 + $0x20] sm:$0xff] }
  0x11   :  { %862 = vmatmul.msk.bf16.vlgmr.msra.gmra.mxu0 %vm202_vm0, %v1039_v23  ;;  %870 = vmatmul.msk.bf16.vlgmr.msra.gmra.mxu1 %vm202_vm0, %v1039_v23  ;;  %v816_v44 = vld [vmem:[#allocation2 + $0x10] sm:$0xf]  ;;  %v829_v46 = vor.u32 %v937_v41, %v826_v43  ;;  %v936_v48 = vld [vmem:[#allocation2 + $0x14] sm:$0xf]  ;;  %v1078_v51 = vld [vmem:[%s1367_s0 + $0x18] sm:$0xff] }
  0x12   :  { %878 = vmatmul.msk.bf16.vlgmr.msra.gmra.mxu2 %vm202_vm0, %v1039_v23  ;;  %429 = vmatpush.bf16.msrb.mxu0 %v849_v34  ;;  %v940_v45 = vld [vmem:[#allocation2 + $0x2c] sm:$0xf0]  ;;  %v818_v49 = vld [vmem:[#allocation2 + $0x30] sm:$0xf0]  ;;  %v1104_v53 = vld [vmem:[%s1367_s0 + $0x28] sm:$0xff] }
  0x13   :  { %527 = vmatpush.bf16.msrb.mxu2 %v857_v29  ;;  %886 = vmatmul.msk.bf16.vlgmr.msra.gmra.mxu3 %vm202_vm0, %v1039_v23  ;;  %v817_v47 = vor.u32 %v940_v45, %v816_v44  ;;  %v821_v50 = vor.u32 %v936_v48, %v818_v49  ;;  %v1117_v54 = vld [vmem:[%s1367_s0 + $0x30] sm:$0xff]  ;;  %v1130_v55 = vld [vmem:[%s1367_s0 + $0x38] sm:$0xff]  ;;  %v1143_v56 = vld [vmem:[%s1369_s2] sm:$0xff]  ;;  %s1009_s0 = smov [#allocation5]  }
  0x14   :  { %576 = vmatpush.bf16.msrb.mxu3 %v861_v30  ;;  %478 = vmatpush.bf16.msrb.mxu1 %v853_v36  ;;  %v1146_v57 = vperm.slane %v1143_v56, 0  ;;  %v1149_v58 = vperm.slane %v1143_v56, 1  ;;  %v1160_v0 = vperm.slane %v1143_v56, 2  ;;  %v1165_v1 = vperm.slane %v1143_v56, 3  ;;  %s751_s2 = sshll.u32 %s1009_s0, 4  ;;  %s752_s2 = int_to_ptr.vmem [resolvable:$true] %s751_s2 }
  0x16   :  { %430 = vmatpush.bf16.msrb.mxu0 %v817_v47 }
  0x17   :  { %528 = vmatpush.bf16.msrb.mxu2 %v825_v42 }
  0x18   :  { %577 = vmatpush.bf16.msrb.mxu3 %v829_v46  ;;  %479 = vmatpush.bf16.msrb.mxu1 %v821_v50 }
  0x21   :  { %863 = vmatmul.msk.bf16.gmra.mxu0 %vm202_vm0, %v1052_v37  ;;  %871 = vmatmul.msk.bf16.gmra.mxu1 %vm202_vm0, %v1052_v37 }
  0x22   :  { %879 = vmatmul.msk.bf16.gmra.mxu2 %vm202_vm0, %v1052_v37 }
  0x23   :  { %887 = vmatmul.msk.bf16.gmra.mxu3 %vm202_vm0, %v1052_v37 }
  0x31   :  { %864 = vmatmul.msk.bf16.gmra.mxu0 %vm202_vm0, %v1065_v38  ;;  %872 = vmatmul.msk.bf16.gmra.mxu1 %vm202_vm0, %v1065_v38 }
  0x32   :  { %880 = vmatmul.msk.bf16.gmra.mxu2 %vm202_vm0, %v1065_v38 }
  0x33   :  { %888 = vmatmul.msk.bf16.gmra.mxu3 %vm202_vm0, %v1065_v38 }
  0x41   :  { %865 = vmatmul.msk.bf16.gmra.mxu0 %vm202_vm0, %v1078_v51  ;;  %873 = vmatmul.msk.bf16.gmra.mxu1 %vm202_vm0, %v1078_v51 }
  0x42   :  { %881 = vmatmul.msk.bf16.gmra.mxu2 %vm202_vm0, %v1078_v51 }
  0x43   :  { %889 = vmatmul.msk.bf16.gmra.mxu3 %vm202_vm0, %v1078_v51 }
  0x51   :  { %866 = vmatmul.msk.bf16.gmra.mxu0 %vm202_vm0, %v1091_v52  ;;  %874 = vmatmul.msk.bf16.gmra.mxu1 %vm202_vm0, %v1091_v52 }
  0x52   :  { %882 = vmatmul.msk.bf16.gmra.mxu2 %vm202_vm0, %v1091_v52 }
  0x53   :  { %890 = vmatmul.msk.bf16.gmra.mxu3 %vm202_vm0, %v1091_v52 }
  0x61   :  { %867 = vmatmul.msk.bf16.gmra.mxu0 %vm202_vm0, %v1104_v53  ;;  %875 = vmatmul.msk.bf16.gmra.mxu1 %vm202_vm0, %v1104_v53 }
  0x62   :  { %883 = vmatmul.msk.bf16.gmra.mxu2 %vm202_vm0, %v1104_v53 }
  0x63   :  { %891 = vmatmul.msk.bf16.gmra.mxu3 %vm202_vm0, %v1104_v53 }
  0x71   :  { %868 = vmatmul.msk.bf16.gmra.mxu0 %vm202_vm0, %v1117_v54  ;;  %876 = vmatmul.msk.bf16.gmra.mxu1 %vm202_vm0, %v1117_v54 }
  0x72   :  { %884 = vmatmul.msk.bf16.gmra.mxu2 %vm202_vm0, %v1117_v54 }
  0x73   :  { %892 = vmatmul.msk.bf16.gmra.mxu3 %vm202_vm0, %v1117_v54 }
  0x81   :  { %869 = vmatmul.msk.bf16.gmra.mxu0 %vm202_vm0, %v1130_v55  ;;  %877 = vmatmul.msk.bf16.gmra.mxu1 %vm202_vm0, %v1130_v55 }
  0x82   :  { %885 = vmatmul.msk.bf16.gmra.mxu2 %vm202_vm0, %v1130_v55 }
  0x83   :  { %893 = vmatmul.msk.bf16.gmra.mxu3 %vm202_vm0, %v1130_v55 }
  0x8e   :  { %v236_v59 = vpop.f32.mrf.mxu0  ;;  %v285_v61 = vpop.f32.mrf.mxu1 }
  0x8f   :  { %v237_v60 = vadd.f32 %v236_v59, %v1146_v57  ;;  %v286_v62 = vadd.f32 %v285_v61, %v1149_v58 }
  0x91   :  { %894 = vmatmul.msk.bf16.vlgmr.msrb.gmra.mxu0 %vm202_vm0, %v1039_v23  ;;  %v619_v63 = vpack.c.bf16 %v286_v62, %v237_v60  ;;  %902 = vmatmul.msk.bf16.vlgmr.msrb.gmra.mxu1 %vm202_vm0, %v1039_v23 }
  0x92   :  { %910 = vmatmul.msk.bf16.vlgmr.msrb.gmra.mxu2 %vm202_vm0, %v1039_v23 }
  0x93   :  { %918 = vmatmul.msk.bf16.vlgmr.msrb.gmra.mxu3 %vm202_vm0, %v1039_v23  ;;  %683 = vst [vmem:[#allocation5] sm:$0xff] %v619_v63 }
  0x95   :  { %v334_v2 = vpop.f32.mrf.mxu2 }
  0x96   :  { %v335_v3 = vadd.f32 %v334_v2, %v1160_v0  ;;  %v383_v4 = vpop.f32.mrf.mxu3  ;;  %v238_v5 = vpop.f32.mrf.mxu0 }
  0x97   :  { %v384_v6 = vadd.f32 %v383_v4, %v1165_v1  ;;  %v239_v7 = vadd.f32 %v238_v5, %v1146_v57  ;;  %v287_v8 = vpop.f32.mrf.mxu1 }
  0x98   :  { %v288_v9 = vadd.f32 %v287_v8, %v1149_v58 }
  0x99   :  { %v620_v10 = vpack.c.bf16 %v384_v6, %v335_v3 }
  0x9a   :  { %v623_v11 = vpack.c.bf16 %v288_v9, %v239_v7 }
  0x9b   :  { %684 = vst [vmem:[#allocation5 + $0x8] sm:$0xff] %v620_v10 }
  0x9c   :  { %687 = vst [vmem:[#allocation5 + $0x20] sm:$0xff] %v623_v11 }
  0x9d   :  { %v336_v12 = vpop.f32.mrf.mxu2 }
  0x9e   :  { %v337_v13 = vadd.f32 %v336_v12, %v1160_v0  ;;  %v385_v14 = vpop.f32.mrf.mxu3  ;;  %v241_v15 = vpop.f32.mrf.mxu0 }
  0x9f   :  { %v386_v16 = vadd.f32 %v385_v14, %v1165_v1  ;;  %v242_v17 = vadd.f32 %v241_v15, %v1146_v57  ;;  %v290_v18 = vpop.f32.mrf.mxu1 }
  0xa0   :  { %v291_v19 = vadd.f32 %v290_v18, %v1149_v58 }
  0xa1   :  { %v624_v20 = vpack.c.bf16 %v386_v16, %v337_v13  ;;  %895 = vmatmul.msk.bf16.gmra.mxu0 %vm202_vm0, %v1052_v37  ;;  %903 = vmatmul.msk.bf16.gmra.mxu1 %vm202_vm0, %v1052_v37 }
  0xa2   :  { %v627_v21 = vpack.c.bf16 %v291_v19, %v242_v17  ;;  %911 = vmatmul.msk.bf16.gmra.mxu2 %vm202_vm0, %v1052_v37 }
  0xa3   :  { %688 = vst [vmem:[#allocation5 + $0x28] sm:$0xff] %v624_v20  ;;  %919 = vmatmul.msk.bf16.gmra.mxu3 %vm202_vm0, %v1052_v37 }
  0xa4   :  { %691 = vst [vmem:[#allocation5 + $0x40] sm:$0xff] %v627_v21 }
  0xa5   :  { %v339_v22 = vpop.f32.mrf.mxu2 }
  0xa6   :  { %v340_v23 = vadd.f32 %v339_v22, %v1160_v0  ;;  %v388_v24 = vpop.f32.mrf.mxu3  ;;  %v243_v25 = vpop.f32.mrf.mxu0 }
  0xa7   :  { %v389_v26 = vadd.f32 %v388_v24, %v1165_v1  ;;  %v244_v27 = vadd.f32 %v243_v25, %v1146_v57  ;;  %v292_v28 = vpop.f32.mrf.mxu1 }
  0xa8   :  { %v293_v29 = vadd.f32 %v292_v28, %v1149_v58 }
  0xa9   :  { %v628_v30 = vpack.c.bf16 %v389_v26, %v340_v23 }
  0xaa   :  { %v631_v31 = vpack.c.bf16 %v293_v29, %v244_v27 }
  0xab   :  { %692 = vst [vmem:[#allocation5 + $0x48] sm:$0xff] %v628_v30 }
  0xac   :  { %695 = vst [vmem:[#allocation5 + $0x60] sm:$0xff] %v631_v31 }
  0xad   :  { %v341_v32 = vpop.f32.mrf.mxu2 }
  0xae   :  { %v342_v33 = vadd.f32 %v341_v32, %v1160_v0  ;;  %v390_v34 = vpop.f32.mrf.mxu3  ;;  %v246_v35 = vpop.f32.mrf.mxu0 }
  0xaf   :  { %v391_v36 = vadd.f32 %v390_v34, %v1165_v1  ;;  %v247_v37 = vadd.f32 %v246_v35, %v1146_v57  ;;  %v295_v39 = vpop.f32.mrf.mxu1 }
  0xb0   :  { %v296_v40 = vadd.f32 %v295_v39, %v1149_v58 }
  0xb1   :  { %v632_v41 = vpack.c.bf16 %v391_v36, %v342_v33  ;;  %896 = vmatmul.msk.bf16.gmra.mxu0 %vm202_vm0, %v1065_v38  ;;  %904 = vmatmul.msk.bf16.gmra.mxu1 %vm202_vm0, %v1065_v38 }
  0xb2   :  { %v635_v42 = vpack.c.bf16 %v296_v40, %v247_v37  ;;  %912 = vmatmul.msk.bf16.gmra.mxu2 %vm202_vm0, %v1065_v38 }
  0xb3   :  { %696 = vst [vmem:[#allocation5 + $0x68] sm:$0xff] %v632_v41  ;;  %920 = vmatmul.msk.bf16.gmra.mxu3 %vm202_vm0, %v1065_v38 }
  0xb4   :  { %699 = vst [vmem:[#allocation5 + $0x80] sm:$0xff] %v635_v42 }
  0xb5   :  { %v344_v43 = vpop.f32.mrf.mxu2 }
  0xb6   :  { %v345_v44 = vadd.f32 %v344_v43, %v1160_v0  ;;  %v393_v45 = vpop.f32.mrf.mxu3  ;;  %v248_v46 = vpop.f32.mrf.mxu0 }
  0xb7   :  { %v394_v47 = vadd.f32 %v393_v45, %v1165_v1  ;;  %v249_v48 = vadd.f32 %v248_v46, %v1146_v57  ;;  %v297_v49 = vpop.f32.mrf.mxu1 }
  0xb8   :  { %v298_v50 = vadd.f32 %v297_v49, %v1149_v58 }
  0xb9   :  { %v636_v59 = vpack.c.bf16 %v394_v47, %v345_v44 }
  0xba   :  { %v639_v60 = vpack.c.bf16 %v298_v50, %v249_v48 }
  0xbb   :  { %700 = vst [vmem:[#allocation5 + $0x88] sm:$0xff] %v636_v59 }
  0xbc   :  { %703 = vst [vmem:[#allocation5 + $0xa0] sm:$0xff] %v639_v60 }
  0xbd   :  { %v346_v61 = vpop.f32.mrf.mxu2 }
  0xbe   :  { %v347_v38 = vadd.f32 %v346_v61, %v1160_v0  ;;  %v395_v62 = vpop.f32.mrf.mxu3  ;;  %v251_v63 = vpop.f32.mrf.mxu0 }
  0xbf   :  { %v396_v2 = vadd.f32 %v395_v62, %v1165_v1  ;;  %v252_v3 = vadd.f32 %v251_v63, %v1146_v57  ;;  %v300_v4 = vpop.f32.mrf.mxu1 }
  0xc0   :  { %v301_v5 = vadd.f32 %v300_v4, %v1149_v58 }
  0xc1   :  { %v640_v6 = vpack.c.bf16 %v396_v2, %v347_v38  ;;  %897 = vmatmul.msk.bf16.gmra.mxu0 %vm202_vm0, %v1078_v51  ;;  %905 = vmatmul.msk.bf16.gmra.mxu1 %vm202_vm0, %v1078_v51 }
  0xc2   :  { %v643_v7 = vpack.c.bf16 %v301_v5, %v252_v3  ;;  %913 = vmatmul.msk.bf16.gmra.mxu2 %vm202_vm0, %v1078_v51 }
  0xc3   :  { %704 = vst [vmem:[#allocation5 + $0xa8] sm:$0xff] %v640_v6  ;;  %921 = vmatmul.msk.bf16.gmra.mxu3 %vm202_vm0, %v1078_v51 }
  0xc4   :  { %707 = vst [vmem:[#allocation5 + $0xc0] sm:$0xff] %v643_v7 }
  0xc5   :  { %v349_v8 = vpop.f32.mrf.mxu2 }
  0xc6   :  { %v350_v9 = vadd.f32 %v349_v8, %v1160_v0  ;;  %v398_v10 = vpop.f32.mrf.mxu3  ;;  %v253_v11 = vpop.f32.mrf.mxu0 }
  0xc7   :  { %v399_v12 = vadd.f32 %v398_v10, %v1165_v1  ;;  %v254_v13 = vadd.f32 %v253_v11, %v1146_v57  ;;  %v302_v14 = vpop.f32.mrf.mxu1 }
  0xc8   :  { %v303_v15 = vadd.f32 %v302_v14, %v1149_v58 }
  0xc9   :  { %v644_v16 = vpack.c.bf16 %v399_v12, %v350_v9 }
  0xca   :  { %v647_v17 = vpack.c.bf16 %v303_v15, %v254_v13 }
  0xcb   :  { %708 = vst [vmem:[#allocation5 + $0xc8] sm:$0xff] %v644_v16 }
  0xcc   :  { %711 = vst [vmem:[#allocation5 + $0xe0] sm:$0xff] %v647_v17 }
  0xcd   :  { %v351_v18 = vpop.f32.mrf.mxu2 }
  0xce   :  { %v352_v51 = vadd.f32 %v351_v18, %v1160_v0  ;;  %v400_v19 = vpop.f32.mrf.mxu3  ;;  %v256_v20 = vpop.f32.mrf.mxu0 }
  0xcf   :  { %v401_v21 = vadd.f32 %v400_v19, %v1165_v1  ;;  %v257_v22 = vadd.f32 %v256_v20, %v1146_v57  ;;  %v305_v23 = vpop.f32.mrf.mxu1 }
  0xd0   :  { %v306_v24 = vadd.f32 %v305_v23, %v1149_v58 }
  0xd1   :  { %v648_v25 = vpack.c.bf16 %v401_v21, %v352_v51  ;;  %898 = vmatmul.msk.bf16.gmra.mxu0 %vm202_vm0, %v1091_v52  ;;  %906 = vmatmul.msk.bf16.gmra.mxu1 %vm202_vm0, %v1091_v52 }
  0xd2   :  { %v651_v26 = vpack.c.bf16 %v306_v24, %v257_v22  ;;  %914 = vmatmul.msk.bf16.gmra.mxu2 %vm202_vm0, %v1091_v52 }
  0xd3   :  { %712 = vst [vmem:[#allocation5 + $0xe8] sm:$0xff] %v648_v25  ;;  %922 = vmatmul.msk.bf16.gmra.mxu3 %vm202_vm0, %v1091_v52 }
  0xd4   :  { %715 = vst [vmem:[#allocation5 + $0x100] sm:$0xff] %v651_v26 }
  0xd5   :  { %v354_v27 = vpop.f32.mrf.mxu2 }
  0xd6   :  { %v355_v28 = vadd.f32 %v354_v27, %v1160_v0  ;;  %v403_v29 = vpop.f32.mrf.mxu3  ;;  %v258_v30 = vpop.f32.mrf.mxu0 }
  0xd7   :  { %v404_v31 = vadd.f32 %v403_v29, %v1165_v1  ;;  %v259_v32 = vadd.f32 %v258_v30, %v1146_v57  ;;  %v307_v33 = vpop.f32.mrf.mxu1 }
  0xd8   :  { %v308_v34 = vadd.f32 %v307_v33, %v1149_v58 }
  0xd9   :  { %v652_v35 = vpack.c.bf16 %v404_v31, %v355_v28 }
  0xda   :  { %v655_v36 = vpack.c.bf16 %v308_v34, %v259_v32 }
  0xdb   :  { %716 = vst [vmem:[#allocation5 + $0x108] sm:$0xff] %v652_v35 }
  0xdc   :  { %719 = vst [vmem:[#allocation5 + $0x120] sm:$0xff] %v655_v36 }
  0xdd   :  { %v356_v37 = vpop.f32.mrf.mxu2 }
  0xde   :  { %v357_v52 = vadd.f32 %v356_v37, %v1160_v0  ;;  %v405_v39 = vpop.f32.mrf.mxu3  ;;  %v261_v40 = vpop.f32.mrf.mxu0 }
  0xdf   :  { %v406_v41 = vadd.f32 %v405_v39, %v1165_v1  ;;  %v262_v42 = vadd.f32 %v261_v40, %v1146_v57  ;;  %v310_v43 = vpop.f32.mrf.mxu1  ;;  %v1284_v39 = vperm.slane %v1143_v56, 4 }
  0xe0   :  { %v311_v44 = vadd.f32 %v310_v43, %v1149_v58 }
  0xe1   :  { %v656_v45 = vpack.c.bf16 %v406_v41, %v357_v52  ;;  %899 = vmatmul.msk.bf16.gmra.mxu0 %vm202_vm0, %v1104_v53  ;;  %907 = vmatmul.msk.bf16.gmra.mxu1 %vm202_vm0, %v1104_v53 }
  0xe2   :  { %v659_v46 = vpack.c.bf16 %v311_v44, %v262_v42  ;;  %915 = vmatmul.msk.bf16.gmra.mxu2 %vm202_vm0, %v1104_v53 }
  0xe3   :  { %720 = vst [vmem:[#allocation5 + $0x128] sm:$0xff] %v656_v45  ;;  %923 = vmatmul.msk.bf16.gmra.mxu3 %vm202_vm0, %v1104_v53 }
  0xe4   :  { %723 = vst [vmem:[#allocation5 + $0x140] sm:$0xff] %v659_v46 }
  0xe5   :  { %v359_v47 = vpop.f32.mrf.mxu2 }
  0xe6   :  { %v360_v48 = vadd.f32 %v359_v47, %v1160_v0  ;;  %v408_v49 = vpop.f32.mrf.mxu3  ;;  %v263_v50 = vpop.f32.mrf.mxu0 }
  0xe7   :  { %v409_v59 = vadd.f32 %v408_v49, %v1165_v1  ;;  %v264_v60 = vadd.f32 %v263_v50, %v1146_v57  ;;  %v312_v61 = vpop.f32.mrf.mxu1  ;;  %v1297_v49 = vperm.slane %v1143_v56, 7 }
  0xe8   :  { %v313_v38 = vadd.f32 %v312_v61, %v1149_v58 }
  0xe9   :  { %v660_v62 = vpack.c.bf16 %v409_v59, %v360_v48  ;;  %v1294_v48 = vperm.slane %v1143_v56, 6 }
  0xea   :  { %v663_v63 = vpack.c.bf16 %v313_v38, %v264_v60 }
  0xeb   :  { %724 = vst [vmem:[#allocation5 + $0x148] sm:$0xff] %v660_v62 }
  0xec   :  { %727 = vst [vmem:[#allocation5 + $0x160] sm:$0xff] %v663_v63 }
  0xed   :  { %v361_v2 = vpop.f32.mrf.mxu2 }
  0xee   :  { %v362_v53 = vadd.f32 %v361_v2, %v1160_v0  ;;  %v410_v3 = vpop.f32.mrf.mxu3  ;;  %v266_v4 = vpop.f32.mrf.mxu0 }
  0xef   :  { %v411_v5 = vadd.f32 %v410_v3, %v1165_v1  ;;  %v267_v6 = vadd.f32 %v266_v4, %v1146_v57  ;;  %v315_v7 = vpop.f32.mrf.mxu1 }
  0xf0   :  { %v316_v8 = vadd.f32 %v315_v7, %v1149_v58 }
  0xf1   :  { %v664_v9 = vpack.c.bf16 %v411_v5, %v362_v53  ;;  %900 = vmatmul.msk.bf16.gmra.mxu0 %vm202_vm0, %v1117_v54  ;;  %908 = vmatmul.msk.bf16.gmra.mxu1 %vm202_vm0, %v1117_v54 }
  0xf2   :  { %v667_v10 = vpack.c.bf16 %v316_v8, %v267_v6  ;;  %916 = vmatmul.msk.bf16.gmra.mxu2 %vm202_vm0, %v1117_v54 }
  0xf3   :  { %728 = vst [vmem:[#allocation5 + $0x168] sm:$0xff] %v664_v9  ;;  %924 = vmatmul.msk.bf16.gmra.mxu3 %vm202_vm0, %v1117_v54 }
  0xf4   :  { %731 = vst [vmem:[#allocation5 + $0x180] sm:$0xff] %v667_v10 }
  0xf5   :  { %v364_v11 = vpop.f32.mrf.mxu2 }
  0xf6   :  { %v365_v12 = vadd.f32 %v364_v11, %v1160_v0  ;;  %v413_v13 = vpop.f32.mrf.mxu3  ;;  %v268_v14 = vpop.f32.mrf.mxu0 }
  0xf7   :  { %v414_v15 = vadd.f32 %v413_v13, %v1165_v1  ;;  %v269_v16 = vadd.f32 %v268_v14, %v1146_v57  ;;  %v317_v17 = vpop.f32.mrf.mxu1 }
  0xf8   :  { %v318_v18 = vadd.f32 %v317_v17, %v1149_v58 }
  0xf9   :  { %v668_v51 = vpack.c.bf16 %v414_v15, %v365_v12 }
  0xfa   :  { %v671_v19 = vpack.c.bf16 %v318_v18, %v269_v16 }
  0xfb   :  { %732 = vst [vmem:[#allocation5 + $0x188] sm:$0xff] %v668_v51 }
  0xfc   :  { %735 = vst [vmem:[#allocation5 + $0x1a0] sm:$0xff] %v671_v19 }
  0xfd   :  { %v366_v20 = vpop.f32.mrf.mxu2 }
  0xfe   :  { %v367_v54 = vadd.f32 %v366_v20, %v1160_v0  ;;  %v415_v21 = vpop.f32.mrf.mxu3  ;;  %v271_v22 = vpop.f32.mrf.mxu0 }
  0xff   :  { %v416_v23 = vadd.f32 %v415_v21, %v1165_v1  ;;  %v272_v24 = vadd.f32 %v271_v22, %v1146_v57  ;;  %v320_v25 = vpop.f32.mrf.mxu1 }
 0x100   :  { %v321_v26 = vadd.f32 %v320_v25, %v1149_v58 }
 0x101   :  { %v672_v27 = vpack.c.bf16 %v416_v23, %v367_v54  ;;  %901 = vmatmul.msk.bf16.gmra.mxu0 %vm202_vm0, %v1130_v55  ;;  %909 = vmatmul.msk.bf16.gmra.mxu1 %vm202_vm0, %v1130_v55 }
 0x102   :  { %v675_v28 = vpack.c.bf16 %v321_v26, %v272_v24  ;;  %917 = vmatmul.msk.bf16.gmra.mxu2 %vm202_vm0, %v1130_v55 }
 0x103   :  { %736 = vst [vmem:[#allocation5 + $0x1a8] sm:$0xff] %v672_v27  ;;  %925 = vmatmul.msk.bf16.gmra.mxu3 %vm202_vm0, %v1130_v55  ;;  %v1287_v55 = vperm.slane %v1143_v56, 5 }
 0x104   :  { %739 = vst [vmem:[#allocation5 + $0x1c0] sm:$0xff] %v675_v28 }
 0x105   :  { %v369_v29 = vpop.f32.mrf.mxu2 }
 0x106   :  { %v370_v30 = vadd.f32 %v369_v29, %v1160_v0  ;;  %v418_v31 = vpop.f32.mrf.mxu3  ;;  %v273_v32 = vpop.f32.mrf.mxu0 }
 0x107   :  { %v419_v33 = vadd.f32 %v418_v31, %v1165_v1  ;;  %v274_v34 = vadd.f32 %v273_v32, %v1146_v57  ;;  %v322_v35 = vpop.f32.mrf.mxu1 }
 0x108   :  { %v323_v36 = vadd.f32 %v322_v35, %v1149_v58 }
 0x109   :  { %v676_v37 = vpack.c.bf16 %v419_v33, %v370_v30 }
 0x10a   :  { %v679_v52 = vpack.c.bf16 %v323_v36, %v274_v34 }
 0x10b   :  { %740 = vst [vmem:[#allocation5 + $0x1c8] sm:$0xff] %v676_v37 }
 0x10c   :  { %743 = vst [vmem:[#allocation5 + $0x1e0] sm:$0xff] %v679_v52 }
 0x10d   :  { %v371_v40 = vpop.f32.mrf.mxu2 }
 0x10e   :  { %v372_v41 = vadd.f32 %v371_v40, %v1160_v0  ;;  %v420_v42 = vpop.f32.mrf.mxu3  ;;  %v432_v43 = vpop.f32.mrf.mxu0 }
 0x10f   :  { %v421_v57 = vadd.f32 %v420_v42, %v1165_v1  ;;  %v433_v44 = vadd.f32 %v432_v43, %v1284_v39  ;;  %v481_v58 = vpop.f32.mrf.mxu1 }
 0x110   :  { %v482_v45 = vadd.f32 %v481_v58, %v1287_v55 }
 0x111   :  { %v680_v46 = vpack.c.bf16 %v421_v57, %v372_v41 }
 0x112   :  { %v621_v47 = vpack.c.bf16 %v482_v45, %v433_v44 }
 0x113   :  { %744 = vst [vmem:[#allocation5 + $0x1e8] sm:$0xff] %v680_v46 }
 0x114   :  { %685 = vst [vmem:[#allocation5 + $0x10] sm:$0xff] %v621_v47 }
 0x115   :  { %v530_v0 = vpop.f32.mrf.mxu2 }
 0x116   :  { %v531_v50 = vadd.f32 %v530_v0, %v1294_v48  ;;  %v579_v59 = vpop.f32.mrf.mxu3  ;;  %v434_v1 = vpop.f32.mrf.mxu0 }
 0x117   :  { %v580_v60 = vadd.f32 %v579_v59, %v1297_v49  ;;  %v435_v61 = vadd.f32 %v434_v1, %v1284_v39  ;;  %v483_v38 = vpop.f32.mrf.mxu1 }
 0x118   :  { %v484_v62 = vadd.f32 %v483_v38, %v1287_v55 }
 0x119   :  { %v622_v63 = vpack.c.bf16 %v580_v60, %v531_v50 }
 0x11a   :  { %v625_v2 = vpack.c.bf16 %v484_v62, %v435_v61 }
 0x11b   :  { %686 = vst [vmem:[#allocation5 + $0x18] sm:$0xff] %v622_v63 }
 0x11c   :  { %689 = vst [vmem:[#allocation5 + $0x30] sm:$0xff] %v625_v2 }
 0x11d   :  { %v532_v53 = vpop.f32.mrf.mxu2 }
 0x11e   :  { %v533_v56 = vadd.f32 %v532_v53, %v1294_v48  ;;  %v581_v3 = vpop.f32.mrf.mxu3  ;;  %v437_v4 = vpop.f32.mrf.mxu0 }
 0x11f   :  { %v582_v5 = vadd.f32 %v581_v3, %v1297_v49  ;;  %v438_v6 = vadd.f32 %v437_v4, %v1284_v39  ;;  %v486_v7 = vpop.f32.mrf.mxu1 }
 0x120   :  { %v487_v8 = vadd.f32 %v486_v7, %v1287_v55 }
 0x121   :  { %v626_v9 = vpack.c.bf16 %v582_v5, %v533_v56 }
 0x122   :  { %v629_v10 = vpack.c.bf16 %v487_v8, %v438_v6 }
 0x123   :  { %690 = vst [vmem:[#allocation5 + $0x38] sm:$0xff] %v626_v9 }
 0x124   :  { %693 = vst [vmem:[#allocation5 + $0x50] sm:$0xff] %v629_v10 }
 0x125   :  { %v535_v11 = vpop.f32.mrf.mxu2 }
 0x126   :  { %v536_v12 = vadd.f32 %v535_v11, %v1294_v48  ;;  %v584_v13 = vpop.f32.mrf.mxu3  ;;  %v439_v14 = vpop.f32.mrf.mxu0 }
 0x127   :  { %v585_v15 = vadd.f32 %v584_v13, %v1297_v49  ;;  %v440_v16 = vadd.f32 %v439_v14, %v1284_v39  ;;  %v488_v17 = vpop.f32.mrf.mxu1 }
 0x128   :  { %v489_v18 = vadd.f32 %v488_v17, %v1287_v55 }
 0x129   :  { %v630_v51 = vpack.c.bf16 %v585_v15, %v536_v12 }
 0x12a   :  { %v633_v19 = vpack.c.bf16 %v489_v18, %v440_v16 }
 0x12b   :  { %694 = vst [vmem:[#allocation5 + $0x58] sm:$0xff] %v630_v51 }
 0x12c   :  { %697 = vst [vmem:[#allocation5 + $0x70] sm:$0xff] %v633_v19 }
 0x12d   :  { %v537_v20 = vpop.f32.mrf.mxu2 }
 0x12e   :  { %v538_v54 = vadd.f32 %v537_v20, %v1294_v48  ;;  %v586_v21 = vpop.f32.mrf.mxu3  ;;  %v442_v22 = vpop.f32.mrf.mxu0 }
 0x12f   :  { %v587_v23 = vadd.f32 %v586_v21, %v1297_v49  ;;  %v443_v24 = vadd.f32 %v442_v22, %v1284_v39  ;;  %v491_v25 = vpop.f32.mrf.mxu1 }
 0x130   :  { %v492_v26 = vadd.f32 %v491_v25, %v1287_v55 }
 0x131   :  { %v634_v27 = vpack.c.bf16 %v587_v23, %v538_v54 }
 0x132   :  { %v637_v28 = vpack.c.bf16 %v492_v26, %v443_v24 }
 0x133   :  { %698 = vst [vmem:[#allocation5 + $0x78] sm:$0xff] %v634_v27 }
 0x134   :  { %701 = vst [vmem:[#allocation5 + $0x90] sm:$0xff] %v637_v28 }
 0x135   :  { %v540_v29 = vpop.f32.mrf.mxu2 }
 0x136   :  { %v541_v30 = vadd.f32 %v540_v29, %v1294_v48  ;;  %v589_v31 = vpop.f32.mrf.mxu3  ;;  %v444_v32 = vpop.f32.mrf.mxu0 }
 0x137   :  { %v590_v33 = vadd.f32 %v589_v31, %v1297_v49  ;;  %v445_v34 = vadd.f32 %v444_v32, %v1284_v39  ;;  %v493_v35 = vpop.f32.mrf.mxu1 }
 0x138   :  { %v494_v36 = vadd.f32 %v493_v35, %v1287_v55 }
 0x139   :  { %v638_v37 = vpack.c.bf16 %v590_v33, %v541_v30 }
 0x13a   :  { %v641_v52 = vpack.c.bf16 %v494_v36, %v445_v34 }
 0x13b   :  { %702 = vst [vmem:[#allocation5 + $0x98] sm:$0xff] %v638_v37 }
 0x13c   :  { %705 = vst [vmem:[#allocation5 + $0xb0] sm:$0xff] %v641_v52 }
 0x13d   :  { %v542_v40 = vpop.f32.mrf.mxu2 }
 0x13e   :  { %v543_v41 = vadd.f32 %v542_v40, %v1294_v48  ;;  %v591_v42 = vpop.f32.mrf.mxu3  ;;  %v447_v43 = vpop.f32.mrf.mxu0 }
 0x13f   :  { %v592_v57 = vadd.f32 %v591_v42, %v1297_v49  ;;  %v448_v44 = vadd.f32 %v447_v43, %v1284_v39  ;;  %v496_v58 = vpop.f32.mrf.mxu1 }
 0x140   :  { %v497_v45 = vadd.f32 %v496_v58, %v1287_v55 }
 0x141   :  { %v642_v46 = vpack.c.bf16 %v592_v57, %v543_v41 }
 0x142   :  { %v645_v47 = vpack.c.bf16 %v497_v45, %v448_v44 }
 0x143   :  { %706 = vst [vmem:[#allocation5 + $0xb8] sm:$0xff] %v642_v46 }
 0x144   :  { %709 = vst [vmem:[#allocation5 + $0xd0] sm:$0xff] %v645_v47 }
 0x145   :  { %v545_v0 = vpop.f32.mrf.mxu2 }
 0x146   :  { %v546_v50 = vadd.f32 %v545_v0, %v1294_v48  ;;  %v594_v59 = vpop.f32.mrf.mxu3  ;;  %v449_v1 = vpop.f32.mrf.mxu0 }
 0x147   :  { %v595_v60 = vadd.f32 %v594_v59, %v1297_v49  ;;  %v450_v61 = vadd.f32 %v449_v1, %v1284_v39  ;;  %v498_v38 = vpop.f32.mrf.mxu1 }
 0x148   :  { %v499_v62 = vadd.f32 %v498_v38, %v1287_v55 }
 0x149   :  { %v646_v63 = vpack.c.bf16 %v595_v60, %v546_v50 }
 0x14a   :  { %v649_v2 = vpack.c.bf16 %v499_v62, %v450_v61 }
 0x14b   :  { %710 = vst [vmem:[#allocation5 + $0xd8] sm:$0xff] %v646_v63 }
 0x14c   :  { %713 = vst [vmem:[#allocation5 + $0xf0] sm:$0xff] %v649_v2 }
 0x14d   :  { %v547_v53 = vpop.f32.mrf.mxu2 }
 0x14e   :  { %v548_v56 = vadd.f32 %v547_v53, %v1294_v48  ;;  %v596_v3 = vpop.f32.mrf.mxu3  ;;  %v452_v4 = vpop.f32.mrf.mxu0 }
 0x14f   :  { %v597_v5 = vadd.f32 %v596_v3, %v1297_v49  ;;  %v453_v6 = vadd.f32 %v452_v4, %v1284_v39  ;;  %v501_v7 = vpop.f32.mrf.mxu1 }
 0x150   :  { %v502_v8 = vadd.f32 %v501_v7, %v1287_v55 }
 0x151   :  { %v650_v9 = vpack.c.bf16 %v597_v5, %v548_v56 }
 0x152   :  { %v653_v10 = vpack.c.bf16 %v502_v8, %v453_v6 }
 0x153   :  { %714 = vst [vmem:[#allocation5 + $0xf8] sm:$0xff] %v650_v9 }
 0x154   :  { %717 = vst [vmem:[#allocation5 + $0x110] sm:$0xff] %v653_v10 }
 0x155   :  { %v550_v11 = vpop.f32.mrf.mxu2 }
 0x156   :  { %v551_v12 = vadd.f32 %v550_v11, %v1294_v48  ;;  %v599_v13 = vpop.f32.mrf.mxu3  ;;  %v454_v14 = vpop.f32.mrf.mxu0 }
 0x157   :  { %v600_v15 = vadd.f32 %v599_v13, %v1297_v49  ;;  %v455_v16 = vadd.f32 %v454_v14, %v1284_v39  ;;  %v503_v17 = vpop.f32.mrf.mxu1 }
 0x158   :  { %v504_v18 = vadd.f32 %v503_v17, %v1287_v55 }
 0x159   :  { %v654_v51 = vpack.c.bf16 %v600_v15, %v551_v12 }
 0x15a   :  { %v657_v19 = vpack.c.bf16 %v504_v18, %v455_v16 }
 0x15b   :  { %718 = vst [vmem:[#allocation5 + $0x118] sm:$0xff] %v654_v51 }
 0x15c   :  { %721 = vst [vmem:[#allocation5 + $0x130] sm:$0xff] %v657_v19 }
 0x15d   :  { %v552_v20 = vpop.f32.mrf.mxu2 }
 0x15e   :  { %v553_v54 = vadd.f32 %v552_v20, %v1294_v48  ;;  %v601_v21 = vpop.f32.mrf.mxu3  ;;  %v457_v22 = vpop.f32.mrf.mxu0 }
 0x15f   :  { %v602_v23 = vadd.f32 %v601_v21, %v1297_v49  ;;  %v458_v24 = vadd.f32 %v457_v22, %v1284_v39  ;;  %v506_v25 = vpop.f32.mrf.mxu1 }
 0x160   :  { %v507_v26 = vadd.f32 %v506_v25, %v1287_v55 }
 0x161   :  { %v658_v27 = vpack.c.bf16 %v602_v23, %v553_v54 }
 0x162   :  { %v661_v28 = vpack.c.bf16 %v507_v26, %v458_v24 }
 0x163   :  { %722 = vst [vmem:[#allocation5 + $0x138] sm:$0xff] %v658_v27 }
 0x164   :  { %725 = vst [vmem:[#allocation5 + $0x150] sm:$0xff] %v661_v28 }
 0x165   :  { %v555_v29 = vpop.f32.mrf.mxu2 }
 0x166   :  { %v556_v30 = vadd.f32 %v555_v29, %v1294_v48  ;;  %v604_v31 = vpop.f32.mrf.mxu3  ;;  %v459_v32 = vpop.f32.mrf.mxu0 }
 0x167   :  { %v605_v33 = vadd.f32 %v604_v31, %v1297_v49  ;;  %v460_v34 = vadd.f32 %v459_v32, %v1284_v39  ;;  %v508_v35 = vpop.f32.mrf.mxu1 }
 0x168   :  { %v509_v36 = vadd.f32 %v508_v35, %v1287_v55 }
 0x169   :  { %v662_v37 = vpack.c.bf16 %v605_v33, %v556_v30 }
 0x16a   :  { %v665_v52 = vpack.c.bf16 %v509_v36, %v460_v34 }
 0x16b   :  { %726 = vst [vmem:[#allocation5 + $0x158] sm:$0xff] %v662_v37 }
 0x16c   :  { %729 = vst [vmem:[#allocation5 + $0x170] sm:$0xff] %v665_v52 }
 0x16d   :  { %v557_v40 = vpop.f32.mrf.mxu2 }
 0x16e   :  { %v558_v41 = vadd.f32 %v557_v40, %v1294_v48  ;;  %v606_v42 = vpop.f32.mrf.mxu3  ;;  %v462_v43 = vpop.f32.mrf.mxu0 }
 0x16f   :  { %v607_v57 = vadd.f32 %v606_v42, %v1297_v49  ;;  %v463_v44 = vadd.f32 %v462_v43, %v1284_v39  ;;  %v511_v58 = vpop.f32.mrf.mxu1 }
 0x170   :  { %v512_v45 = vadd.f32 %v511_v58, %v1287_v55 }
 0x171   :  { %v666_v46 = vpack.c.bf16 %v607_v57, %v558_v41 }
 0x172   :  { %v669_v47 = vpack.c.bf16 %v512_v45, %v463_v44 }
 0x173   :  { %730 = vst [vmem:[#allocation5 + $0x178] sm:$0xff] %v666_v46 }
 0x174   :  { %733 = vst [vmem:[#allocation5 + $0x190] sm:$0xff] %v669_v47 }
 0x175   :  { %v560_v0 = vpop.f32.mrf.mxu2 }
 0x176   :  { %v561_v50 = vadd.f32 %v560_v0, %v1294_v48  ;;  %v609_v59 = vpop.f32.mrf.mxu3  ;;  %v464_v1 = vpop.f32.mrf.mxu0 }
 0x177   :  { %v610_v60 = vadd.f32 %v609_v59, %v1297_v49  ;;  %v465_v61 = vadd.f32 %v464_v1, %v1284_v39  ;;  %v513_v38 = vpop.f32.mrf.mxu1 }
 0x178   :  { %v514_v62 = vadd.f32 %v513_v38, %v1287_v55 }
 0x179   :  { %v670_v63 = vpack.c.bf16 %v610_v60, %v561_v50 }
 0x17a   :  { %v673_v2 = vpack.c.bf16 %v514_v62, %v465_v61 }
 0x17b   :  { %734 = vst [vmem:[#allocation5 + $0x198] sm:$0xff] %v670_v63 }
 0x17c   :  { %737 = vst [vmem:[#allocation5 + $0x1b0] sm:$0xff] %v673_v2 }
 0x17d   :  { %v562_v53 = vpop.f32.mrf.mxu2 }
 0x17e   :  { %v563_v56 = vadd.f32 %v562_v53, %v1294_v48  ;;  %v611_v3 = vpop.f32.mrf.mxu3  ;;  %v467_v4 = vpop.f32.mrf.mxu0 }
 0x17f   :  { %v612_v5 = vadd.f32 %v611_v3, %v1297_v49  ;;  %v468_v6 = vadd.f32 %v467_v4, %v1284_v39  ;;  %v516_v7 = vpop.f32.mrf.mxu1 }
 0x180   :  { %v517_v8 = vadd.f32 %v516_v7, %v1287_v55 }
 0x181   :  { %v674_v9 = vpack.c.bf16 %v612_v5, %v563_v56 }
 0x182   :  { %v677_v10 = vpack.c.bf16 %v517_v8, %v468_v6 }
 0x183   :  { %738 = vst [vmem:[#allocation5 + $0x1b8] sm:$0xff] %v674_v9 }
 0x184   :  { %741 = vst [vmem:[#allocation5 + $0x1d0] sm:$0xff] %v677_v10 }
 0x185   :  { %v565_v11 = vpop.f32.mrf.mxu2 }
 0x186   :  { %v566_v12 = vadd.f32 %v565_v11, %v1294_v48  ;;  %v614_v13 = vpop.f32.mrf.mxu3  ;;  %v469_v14 = vpop.f32.mrf.mxu0 }
 0x187   :  { %v615_v15 = vadd.f32 %v614_v13, %v1297_v49  ;;  %v470_v16 = vadd.f32 %v469_v14, %v1284_v39  ;;  %v518_v17 = vpop.f32.mrf.mxu1 }
 0x188   :  { %v519_v18 = vadd.f32 %v518_v17, %v1287_v55 }
 0x189   :  { %v678_v51 = vpack.c.bf16 %v615_v15, %v566_v12 }
 0x18a   :  { %v681_v19 = vpack.c.bf16 %v519_v18, %v470_v16 }
 0x18b   :  { %742 = vst [vmem:[#allocation5 + $0x1d8] sm:$0xff] %v678_v51 }
 0x18c   :  { %745 = vst [vmem:[#allocation5 + $0x1f0] sm:$0xff] %v681_v19 }
 0x18d   :  { %v567_v20 = vpop.f32.mrf.mxu2 }
 0x18e   :  { %v568_v54 = vadd.f32 %v567_v20, %v1294_v48  ;;  %v616_v21 = vpop.f32.mrf.mxu3 }
 0x18f   :  { %v617_v22 = vadd.f32 %v616_v21, %v1297_v49 }
 0x191   :  { %v682_v39 = vpack.c.bf16 %v617_v22, %v568_v54 }
 0x193   :  { %746 = vst [vmem:[#allocation5 + $0x1f8] sm:$0xff] %v682_v39 }
 0x194   :  { %759 = dma.vmem_to_hbm [thread:$0]  %s752_s2, 8192, %s754_s11, [#allocation4], %s1007_s17, %s1007_s17, %s1008_s18  }
 0x195   :  { %1004 = dma.done.wait [#allocation4], 8192  }
 0x196   :  { %1005 = vsyncadd [#allocation4], 4294959104 }
 0x197   :  { %764 = vsyncpa [#allocation3], 1 }
 0x198   :  { %765 = vsyncpa [#allocation4], 1 }

</bundles_post_ra>
